<compile_context>
chip_gen: v5e
topology: v5e:2x2
jax: 0.10.0
libtpu: 0.0.40
codegen_flags: <defaults>
</compile_context>

<pallas_src>
import jax
import jax.numpy as jnp
from jax.experimental import pallas as pl
from jax.experimental.pallas import tpu as pltpu


# ---------------------------------------------------------------------------
# helpers
# ---------------------------------------------------------------------------
def _round_up(x, m):
    return ((x + m - 1) // m) * m


def _pick_tile(dim, target, align):
    """Largest legal tile <= target, preferring choices that need no padding.

    - dim <= target: use the full dim (always legal, never padded).
    - otherwise: largest multiple of `align` <= target that divides dim.
    - fallback: aligned target (caller pads).
    """
    if dim <= target:
        return dim
    t = max((target // align) * align, align)
    s = t
    while s >= align:
        if dim % s == 0:
            return s
        s -= align
    return t


def _pad2d(a, rows, cols):
    r, c = a.shape
    if r == rows and c == cols:
        return a
    return jnp.pad(a, ((0, rows - r), (0, cols - c)))


def _pick_vmem_limit():
    """Generation-aware scoped-VMEM budget."""
    cap = None
    try:
        cap = pltpu.get_tpu_info().vmem_capacity_bytes
    except Exception:
        cap = None
    if cap is None:
        cap = 64 * 1024 * 1024
    if cap <= 64 * 1024 * 1024:        # v7x-class: 64 MiB physical, leave headroom
        return 40 * 1024 * 1024
    return 80 * 1024 * 1024            # v5e / v6e: 128 MiB physical


_VMEM_LIMIT = _pick_vmem_limit()


# ---------------------------------------------------------------------------
# Pass 1: EMA target update (fp32) + bf16 compute copies of both weight mats.
# Pure HBM-bandwidth pass; the bf16 outputs feed the MXU pass so fp32 weights
# are never re-read by the matmul.
# ---------------------------------------------------------------------------
def _make_ema_cast_kernel(beta):
    beta = float(beta)

    def _kernel(t_ref, w_ref, tnew_ref, tbf_ref, wbf_ref):
        w = w_ref[...]
        t_new = beta * t_ref[...] + (1.0 - beta) * w        # fp32 EMA (VPU)
        tnew_ref[...] = t_new
        tbf_ref[...] = t_new.astype(jnp.bfloat16)
        wbf_ref[...] = w.astype(jnp.bfloat16)

    return _kernel


def ema_update(w_target, w_online, *, beta=0.99, tr=256, tc=2048):
    """w_target, w_online: [H, V] f32.

    Returns (new_target_f32 [H,V], new_target_bf16 [H,V], online_bf16 [H,V]).
    """
    H, V = w_target.shape
    assert w_online.shape == (H, V)

    tr = _pick_tile(H, tr, 16)     # 16: bf16 sublane packing of the bf16 outputs
    tc = _pick_tile(V, tc, 128)    # lane-dense columns
    Hp, Vp = _round_up(H, tr), _round_up(V, tc)

    t = _pad2d(w_target.astype(jnp.float32), Hp, Vp)
    w = _pad2d(w_online.astype(jnp.float32), Hp, Vp)

    spec = pl.BlockSpec((tr, tc), lambda i, j: (i, j))
    t_new, t_bf, w_bf = pl.pallas_call(
        _make_ema_cast_kernel(beta),
        out_shape=(
            jax.ShapeDtypeStruct((Hp, Vp), jnp.float32),
            jax.ShapeDtypeStruct((Hp, Vp), jnp.bfloat16),
            jax.ShapeDtypeStruct((Hp, Vp), jnp.bfloat16),
        ),
        grid=(Hp // tr, Vp // tc),
        in_specs=[spec, spec],
        out_specs=(spec, spec, spec),
        compiler_params=pltpu.CompilerParams(
            dimension_semantics=("parallel", "parallel"),
            vmem_limit_bytes=_VMEM_LIMIT,
        ),
        cost_estimate=pl.CostEstimate(
            flops=3 * Hp * Vp,
            transcendentals=0,
            # read 2x f32, write 1x f32 + 2x bf16
            bytes_accessed=Hp * Vp * (4 + 4 + 4 + 2 + 2),
        ),
    )(t, w)
    return t_new[:H, :V], t_bf[:H, :V], w_bf[:H, :V]


# ---------------------------------------------------------------------------
# Pass 2: fused dual matmul (online + target logits) with bf16 operands and
# fp32 VMEM accumulators. K is the innermost (reduction) axis.
# ---------------------------------------------------------------------------
def _dual_matmul_kernel(x_ref, won_ref, wtg_ref, on_ref, tg_ref, acc_on, acc_tg):
    k = pl.program_id(2)

    x = x_ref[...]                                            # (tm, tk) bf16
    p_on = jnp.dot(x, won_ref[...], preferred_element_type=jnp.float32)
    p_tg = jnp.dot(x, wtg_ref[...], preferred_element_type=jnp.float32)

    @pl.when(k == 0)
    def _():                                                  # write, don't zero-init
        acc_on[...] = p_on
        acc_tg[...] = p_tg

    @pl.when(k > 0)
    def _():
        acc_on[...] += p_on
        acc_tg[...] += p_tg

    @pl.when(k == pl.num_programs(2) - 1)
    def _():
        on_ref[...] = acc_on[...].astype(on_ref.dtype)
        tg_ref[...] = acc_tg[...].astype(tg_ref.dtype)


def dual_lm_head(x_bf, w_on_bf, w_tg_bf, *, tm=1024, tn=512, tk=1024):
    """x_bf [M,K] bf16; w_on_bf, w_tg_bf [K,N] bf16 -> two [M,N] f32 logit mats."""
    M, K = x_bf.shape
    K2, N = w_on_bf.shape
    assert K == K2 and w_tg_bf.shape == (K, N)

    tm = _pick_tile(M, tm, 16)
    tn = _pick_tile(N, tn, 128)
    tk = _pick_tile(K, tk, 128)
    Mp, Kp, Np = _round_up(M, tm), _round_up(K, tk), _round_up(N, tn)

    x_bf = _pad2d(x_bf, Mp, Kp)
    w_on_bf = _pad2d(w_on_bf, Kp, Np)
    w_tg_bf = _pad2d(w_tg_bf, Kp, Np)

    grid = (Mp // tm, Np // tn, Kp // tk)
    n_i, n_j = grid[0], grid[1]
    bytes_accessed = (Mp * Kp * 2 * n_j        # x re-read once per N tile
                      + 2 * Kp * Np * 2 * n_i  # both weight streams, once per M tile
                      + 2 * Mp * Np * 4)       # two f32 logit outputs

    on, tg = pl.pallas_call(
        _dual_matmul_kernel,
        out_shape=(
            jax.ShapeDtypeStruct((Mp, Np), jnp.float32),
            jax.ShapeDtypeStruct((Mp, Np), jnp.float32),
        ),
        grid_spec=pltpu.PrefetchScalarGridSpec(
            num_scalar_prefetch=0,
            grid=grid,
            in_specs=[
                pl.BlockSpec((tm, tk), lambda i, j, k: (i, k)),
                pl.BlockSpec((tk, tn), lambda i, j, k: (k, j)),
                pl.BlockSpec((tk, tn), lambda i, j, k: (k, j)),
            ],
            out_specs=(
                pl.BlockSpec((tm, tn), lambda i, j, k: (i, j)),
                pl.BlockSpec((tm, tn), lambda i, j, k: (i, j)),
            ),
            scratch_shapes=[pltpu.VMEM((tm, tn), jnp.float32),
                            pltpu.VMEM((tm, tn), jnp.float32)],
        ),
        compiler_params=pltpu.CompilerParams(
            dimension_semantics=("parallel", "parallel", "arbitrary"),
            vmem_limit_bytes=_VMEM_LIMIT,
        ),
        cost_estimate=pl.CostEstimate(
            flops=2 * 2 * Mp * Np * Kp,
            transcendentals=0,
            bytes_accessed=bytes_accessed,
        ),
    )(x_bf, w_on_bf, w_tg_bf)
    return on[:M, :N], tg[:M, :N]


# ---------------------------------------------------------------------------
# Standalone single LM-head matmul (same tiling recipe, bf16 operands).
# ---------------------------------------------------------------------------
def _matmul_kernel(x_ref, w_ref, o_ref, acc_ref):
    k = pl.program_id(2)
    p = jnp.dot(x_ref[...], w_ref[...], preferred_element_type=jnp.float32)

    @pl.when(k == 0)
    def _():
        acc_ref[...] = p

    @pl.when(k > 0)
    def _():
        acc_ref[...] += p

    @pl.when(k == pl.num_programs(2) - 1)
    def _():
        o_ref[...] = acc_ref[...].astype(o_ref.dtype)


def lm_head(x, w, *, tm=1024, tn=512, tk=1024):
    """x: [B, S, H] f32, w: [H, V] f32 -> logits [B, S, V] f32."""
    B, S, H = x.shape
    H2, V = w.shape
    assert H == H2
    M = B * S

    x2 = x.reshape(M, H).astype(jnp.bfloat16)
    wb = w.astype(jnp.bfloat16)                 # single cast pass, bf16 stream in-kernel

    tm = _pick_tile(M, tm, 16)
    tn = _pick_tile(V, tn, 128)
    tk = _pick_tile(H, tk, 128)
    Mp, Kp, Np = _round_up(M, tm), _round_up(H, tk), _round_up(V, tn)
    x2 = _pad2d(x2, Mp, Kp)
    wb = _pad2d(wb, Kp, Np)

    grid = (Mp // tm, Np // tn, Kp // tk)
    n_i, n_j = grid[0], grid[1]
    out = pl.pallas_call(
        _matmul_kernel,
        out_shape=jax.ShapeDtypeStruct((Mp, Np), jnp.float32),
        grid_spec=pltpu.PrefetchScalarGridSpec(
            num_scalar_prefetch=0,
            grid=grid,
            in_specs=[
                pl.BlockSpec((tm, tk), lambda i, j, k: (i, k)),
                pl.BlockSpec((tk, tn), lambda i, j, k: (k, j)),
            ],
            out_specs=pl.BlockSpec((tm, tn), lambda i, j, k: (i, j)),
            scratch_shapes=[pltpu.VMEM((tm, tn), jnp.float32)],
        ),
        compiler_params=pltpu.CompilerParams(
            dimension_semantics=("parallel", "parallel", "arbitrary"),
            vmem_limit_bytes=_VMEM_LIMIT,
        ),
        cost_estimate=pl.CostEstimate(
            flops=2 * Mp * Np * Kp,
            transcendentals=0,
            bytes_accessed=Mp * Kp * 2 * n_j + Kp * Np * 2 * n_i + Mp * Np * 4,
        ),
    )(x2, wb)
    return out[:M, :V].reshape(B, S, V)


# ---------------------------------------------------------------------------
# Fused QRLHF step: EMA bandwidth pass + dual-matmul MXU pass.
# ---------------------------------------------------------------------------
def qrlhf_step(x, w_online, w_target, *, beta=0.99, tm=1024, tn=512, tk=1024):
    """x: [B,S,H] f32; w_online, w_target: [H,V] f32.

    Returns (online_logits [B,S,V] f32, target_logits [B,S,V] f32,
             new_target_weights [H,V] f32).
    """
    B, S, H = x.shape
    H2, V = w_online.shape
    assert H == H2 and w_target.shape == (H, V)
    M = B * S

    # Pass 1: fp32 EMA + bf16 compute copies of both weight matrices.
    w_tgt_new, w_tgt_bf, w_on_bf = ema_update(w_target, w_online, beta=beta)

    # Pass 2: both matmuls against the shared bf16 activation stream.
    x2 = x.reshape(M, H).astype(jnp.bfloat16)
    on, tg = dual_lm_head(x2, w_on_bf, w_tgt_bf, tm=tm, tn=tn, tk=tk)

    return on.reshape(B, S, V), tg.reshape(B, S, V), w_tgt_new


# ---------------------------------------------------------------------------
if __name__ == "__main__":
    # Small deterministic shapes: batch=2, seq=8, hidden=32, vocab=128.
    B, S, H, V = 2, 8, 32, 128
    BETA = 0.99

    key = jax.random.PRNGKey(0)
    k_x, k_w, k_t = jax.random.split(key, 3)

    x = jax.random.normal(k_x, (B, S, H), dtype=jnp.float32)
    w_online = 0.02 * jax.random.normal(k_w, (H, V), dtype=jnp.float32)
    w_target = 0.02 * jax.random.normal(k_t, (H, V), dtype=jnp.float32)

    # ---- plain-JAX references ---------------------------------------------
    hp = jax.lax.Precision.HIGHEST
    xr = x.reshape(B * S, H).astype(jnp.bfloat16).astype(jnp.float32)
    wr_on = w_online.astype(jnp.bfloat16).astype(jnp.float32)
    ref_tgt_w = BETA * w_target + (1.0 - BETA) * w_online
    wr_tg = ref_tgt_w.astype(jnp.bfloat16).astype(jnp.float32)
    ref_on_logits = jnp.dot(xr, wr_on, precision=hp).reshape(B, S, V)
    ref_tg_logits = jnp.dot(xr, wr_tg, precision=hp).reshape(B, S, V)

    # ---- fused hot path: EMA pass + dual-matmul pass -----------------------
    on_logits, tg_logits, w_target_new = qrlhf_step(
        x, w_online, w_target, beta=BETA)

    # ---- standalone building block ------------------------------------------
    on_logits2 = lm_head(x, w_online)

    jax.block_until_ready((on_logits, tg_logits, w_target_new, on_logits2))

    # bf16 matmul operands, fp32 accumulation -> compare vs bf16-rounded ref.
    assert jnp.allclose(on_logits, ref_on_logits, atol=1e-3, rtol=1e-3)
    assert jnp.allclose(tg_logits, ref_tg_logits, atol=1e-3, rtol=1e-3)
    assert jnp.allclose(on_logits2, ref_on_logits, atol=1e-3, rtol=1e-3)
    # EMA itself is done entirely in fp32.
    assert jnp.allclose(w_target_new, ref_tgt_w, atol=1e-6, rtol=1e-6)

    print("KERNEL_OK")
</pallas_src>

<mosaic_0001>
module attributes {stable_mosaic.version = 11 : i64} {
  func.func @_kernel(%arg0: i32, %arg1: i32, %arg2: memref<32x128xf32, #tpu.memory_space<vmem>>, %arg3: memref<32x128xf32, #tpu.memory_space<vmem>>, %arg4: memref<32x128xf32, #tpu.memory_space<vmem>>, %arg5: memref<32x128xbf16, #tpu.memory_space<vmem>>, %arg6: memref<32x128xbf16, #tpu.memory_space<vmem>>) attributes {dimension_semantics = [#tpu.dimension_semantics<parallel>, #tpu.dimension_semantics<parallel>], iteration_bounds = array<i64: 1, 1>, scalar_prefetch = 0 : i64, scratch_operands = 0 : i64, tpu.core_type = #tpu.core_type<tc>, window_params = [{transform_indices = @transform_0, window_bounds = array<i64: 32, 128>}, {transform_indices = @transform_1, window_bounds = array<i64: 32, 128>}, {transform_indices = @transform_2, window_bounds = array<i64: 32, 128>}, {transform_indices = @transform_3, window_bounds = array<i64: 32, 128>}, {transform_indices = @transform_4, window_bounds = array<i64: 32, 128>}]} {
    %c0 = arith.constant 0 : index
    %c0_0 = arith.constant 0 : index
    %0 = vector.load %arg3[%c0, %c0_0] : memref<32x128xf32, #tpu.memory_space<vmem>>, vector<32x128xf32>
    %c0_1 = arith.constant 0 : index
    %c0_2 = arith.constant 0 : index
    %1 = vector.load %arg2[%c0_1, %c0_2] : memref<32x128xf32, #tpu.memory_space<vmem>>, vector<32x128xf32>
    %cst = arith.constant 9.900000e-01 : f32
    %2 = vector.broadcast %cst : f32 to vector<32x128xf32>
    %3 = arith.mulf %2, %1 : vector<32x128xf32>
    %cst_3 = arith.constant 0.00999999977 : f32
    %4 = vector.broadcast %cst_3 : f32 to vector<32x128xf32>
    %5 = arith.mulf %4, %0 : vector<32x128xf32>
    %6 = arith.addf %3, %5 : vector<32x128xf32>
    %c0_4 = arith.constant 0 : index
    %c0_5 = arith.constant 0 : index
    %7 = vector.load %arg4[%c0_4, %c0_5] : memref<32x128xf32, #tpu.memory_space<vmem>>, vector<32x128xf32>
    tpu.vector_store %arg4[%c0_4, %c0_5], %6 {strides = array<i32>} : memref<32x128xf32, #tpu.memory_space<vmem>>, vector<32x128xf32>,
    %8 = arith.truncf %6 : vector<32x128xf32> to vector<32x128xbf16>
    %c0_6 = arith.constant 0 : index
    %c0_7 = arith.constant 0 : index
    %9 = vector.load %arg5[%c0_6, %c0_7] : memref<32x128xbf16, #tpu.memory_space<vmem>>, vector<32x128xbf16>
    tpu.vector_store %arg5[%c0_6, %c0_7], %8 {strides = array<i32>} : memref<32x128xbf16, #tpu.memory_space<vmem>>, vector<32x128xbf16>,
    %10 = arith.truncf %0 : vector<32x128xf32> to vector<32x128xbf16>
    %c0_8 = arith.constant 0 : index
    %c0_9 = arith.constant 0 : index
    %11 = vector.load %arg6[%c0_8, %c0_9] : memref<32x128xbf16, #tpu.memory_space<vmem>>, vector<32x128xbf16>
    tpu.vector_store %arg6[%c0_8, %c0_9], %10 {strides = array<i32>} : memref<32x128xbf16, #tpu.memory_space<vmem>>, vector<32x128xbf16>,
    return
  }
  func.func @transform_0(%arg0: i32, %arg1: i32) -> (i32, i32) {
    %c0_i32 = arith.constant 0 : i32
    return %arg0, %arg1 : i32, i32
  }
  func.func @transform_1(%arg0: i32, %arg1: i32) -> (i32, i32) {
    %c0_i32 = arith.constant 0 : i32
    return %arg0, %arg1 : i32, i32
  }
  func.func @transform_2(%arg0: i32, %arg1: i32) -> (i32, i32) {
    %c0_i32 = arith.constant 0 : i32
    return %arg0, %arg1 : i32, i32
  }
  func.func @transform_3(%arg0: i32, %arg1: i32) -> (i32, i32) {
    %c0_i32 = arith.constant 0 : i32
    return %arg0, %arg1 : i32, i32
  }
  func.func @transform_4(%arg0: i32, %arg1: i32) -> (i32, i32) {
    %c0_i32 = arith.constant 0 : i32
    return %arg0, %arg1 : i32, i32
  }
}

</mosaic_0001>

<bundles_post_ra>
// kernel: tpu_custom_call.1
= control target key start
LH: loop header
LB: loop body
LE: loop exit
PB: predicated region body
PF: predicated region fallthrough
CT: control target
= control target key end

     0   :  { %10 = vsyncpa [#allocation3], 0  ;;  %s363_s0 = inlined_call_operand.hbm [shape: f32[32,128], index: 0, kind: input, shape index: {}]   ;;  %s364_s1 = inlined_call_operand.hbm [shape: f32[32,128], index: 1, kind: input, shape index: {}]   ;;  %s365_s2 = inlined_call_operand.hbm [shape: f32[32,128], index: 2, kind: output, shape index: {0}]   ;;  %s366_s3 = inlined_call_operand.hbm [shape: bf16[32,128], index: 3, kind: output, shape index: {1}]   ;;  %s367_s4 = inlined_call_operand.hbm [shape: bf16[32,128], index: 4, kind: output, shape index: {2}]  }
   0x1   :  { %11 = vsyncpa [#allocation6], 0 }
   0x2   :  { %12 = vsyncpa [#allocation4], 0 }
   0x3   :  { %13 = vsyncpa [#allocation9], 0  ;;  %s18_s17 = sshll.u32 %s363_s0, 4  ;;  %s302_s18 = smov [#allocation2]   ;;  %s19_s17 = int_to_ptr.hbm [resolvable:$true] %s18_s17 }
   0x4   :  { %s20_s19 = sshll.u32 %s302_s18, 4  ;;  %s31_s22 = sshll.u32 %s364_s1, 4  ;;  %s21_s19 = int_to_ptr.vmem [resolvable:$true] %s20_s19  ;;  %s32_s22 = int_to_ptr.hbm [resolvable:$true] %s31_s22 }
   0x5   :  { %s303_s23 = smov 128   ;;  %s304_s24 = smov 8  }
   0x6   :  { %26 = dma.hbm_to_vmem [thread:$0]  %s19_s17, 512, %s21_s19, [#allocation3], %s303_s23, %s303_s23, %s304_s24  }
   0x7   :  { %s305_s25 = smov [#allocation5]  }
   0x8   :  { %s33_s26 = sshll.u32 %s305_s25, 4  ;;  %s34_s26 = int_to_ptr.vmem [resolvable:$true] %s33_s26 }
   0x9   :  { %39 = dma.hbm_to_vmem [thread:$0]  %s32_s22, 512, %s34_s26, [#allocation6], %s303_s23, %s303_s23, %s304_s24  }
   0xa   :  { %294 = dma.done.wait [#allocation3], 512  }
   0xb   :  { %295 = vsyncadd [#allocation3], 4294966784 }
   0xc   :  { %296 = dma.done.wait [#allocation6], 512  }
   0xd   :  { %297 = vsyncadd [#allocation6], 4294966784  ;;  %s306_s0 = smov [#allocation8]   ;;  %s107_s29 = sshll.u32 %s366_s3, 4  ;;  %v48_v0 = vld [vmem:[#allocation5] sm:$0xff]  ;;  %v49_v1 = vld [vmem:[#allocation5 + $0x8] sm:$0xff]  ;;  %s108_s29 = int_to_ptr.hbm [resolvable:$true] %s107_s29 }
   0xe   :  { %s348_s1 = sshll.u32 %s306_s0, 4  ;;  %v52_v2 = vld [vmem:[#allocation2] sm:$0xff]  ;;  %v53_v3 = vld [vmem:[#allocation2 + $0x8] sm:$0xff]  ;;  %v60_v5 = vmul.f32 0.01, %v48_v0  ;;  %v50_v6 = vld [vmem:[#allocation5 + $0x10] sm:$0xff]  ;;  %v156_v7 = vpack.c.bf16 %v49_v1, %v48_v0  ;;  %s106_s1 = int_to_ptr.vmem [resolvable:$true] %s348_s1 }
   0xf   :  { %v56_v4 = vmul.f32 0.99, %v52_v2  ;;  %v57_v8 = vmul.f32 0.99, %v53_v3  ;;  %v61_v9 = vmul.f32 0.01, %v49_v1 }
  0x10   :  { %v51_v10 = vld [vmem:[#allocation5 + $0x18] sm:$0xff]  ;;  %v54_v11 = vld [vmem:[#allocation2 + $0x10] sm:$0xff]  ;;  %v62_v15 = vmul.f32 0.01, %v50_v6  ;;  %157 = vst [vmem:[#allocation10] sm:$0xff] %v156_v7   ;;  %s307_s3 = smov [#allocation7]  }
  0x11   :  { %v64_v12 = vadd.f32 %v60_v5, %v56_v4  ;;  %v55_v13 = vld [vmem:[#allocation2 + $0x18] sm:$0xff]  ;;  %v58_v14 = vmul.f32 0.99, %v54_v11  ;;  %v65_v16 = vadd.f32 %v61_v9, %v57_v8  ;;  %v63_v18 = vmul.f32 0.01, %v51_v10  ;;  %s92_s30 = sshll.u32 %s307_s3, 4  ;;  %s93_s30 = int_to_ptr.vmem [resolvable:$true] %s92_s30 }
  0x12   :  { %v59_v17 = vmul.f32 0.99, %v55_v13  ;;  %s94_s7 = sshll.u32 %s365_s2, 4  ;;  %s308_s8 = smov [#allocation10]   ;;  %v161_v22 = vpack.c.bf16 %v51_v10, %v50_v6  ;;  %s95_s7 = int_to_ptr.hbm [resolvable:$true] %s94_s7 }
  0x13   :  { %68 = vst [vmem:[#allocation7] sm:$0xff] %v64_v12  ;;  %v66_v19 = vadd.f32 %v62_v15, %v58_v14  ;;  %v146_v20 = vpack.c.bf16 %v65_v16, %v64_v12  ;;  %s118_s9 = sshll.u32 %s308_s8, 4  ;;  %s120_s12 = sshll.u32 %s367_s4, 4  ;;  %s119_s9 = int_to_ptr.vmem [resolvable:$true] %s118_s9  ;;  %s121_s12 = int_to_ptr.hbm [resolvable:$true] %s120_s12 }
  0x14   :  { %69 = vst [vmem:[#allocation7 + $0x8] sm:$0xff] %v65_v16  ;;  %v67_v21 = vadd.f32 %v63_v18, %v59_v17  ;;  %s309_s2 = smov 64   ;;  %s310_s13 = smov 4  }
  0x15   :  { %70 = vst [vmem:[#allocation7 + $0x10] sm:$0xff] %v66_v19 }
  0x16   :  { %147 = vst [vmem:[#allocation8] sm:$0xff] %v146_v20   ;;  %v151_v23 = vpack.c.bf16 %v67_v21, %v66_v19 }
  0x17   :  { %71 = vst [vmem:[#allocation7 + $0x18] sm:$0xff] %v67_v21 }
  0x18   :  { %163 = vst [vmem:[#allocation8 + $0x8] sm:$0xff] %v151_v23   ;;  %100 = dma.vmem_to_hbm [thread:$0]  %s93_s30, 512, %s95_s7, [#allocation4], %s303_s23, %s303_s23, %s304_s24  }
  0x19   :  { %164 = vst [vmem:[#allocation10 + $0x8] sm:$0xff] %v161_v22   ;;  %113 = dma.vmem_to_hbm [thread:$0]  %s106_s1, 256, %s108_s29, [#allocation9], %s309_s2, %s309_s2, %s310_s13  }
  0x1a   :  { %126 = dma.vmem_to_hbm [thread:$0]  %s119_s9, 256, %s121_s12, [#allocation9], %s309_s2, %s309_s2, %s310_s13  }
  0x1b   :  { %298 = dma.done.wait [#allocation4], 512  }
  0x1c   :  { %299 = vsyncadd [#allocation4], 4294966784 }
  0x1d   :  { %300 = dma.done.wait [#allocation9], 512  }
  0x1e   :  { %301 = vsyncadd [#allocation9], 4294966784 }
  0x1f   :  { %139 = vsyncpa [#allocation3], 1 }
  0x20   :  { %140 = vsyncpa [#allocation6], 1 }
  0x21   :  { %141 = vsyncpa [#allocation4], 1 }
  0x22   :  { %142 = vsyncpa [#allocation9], 1 }

</bundles_post_ra>
